<compile_context>
chip_gen: v5e
topology: v5e:2x2
jax: 0.10.0
libtpu: 0.0.40
codegen_flags: <defaults>
</compile_context>

<pallas_src>
import jax
import jax.numpy as jnp
from jax.experimental import pallas as pl
from jax.experimental.pallas import tpu as pltpu


def _round_up(x, m):
    return ((x + m - 1) // m) * m


def _make_fused_head_kernel(kc, compute_dtype):
    def kernel(x_ref, wt_ref, b_ref, cls_ref, reg_ref):
        # x_ref:   (1, C, ts)   spatial tile of one batch element (channels-first)
        # wt_ref:  (Kf, C)      fused transposed 1x1-conv weight (resident)
        # b_ref:   (Kf, 1)      fused bias, f32 (resident)
        # cls_ref: (1, Kc, ts)  classification tile (NCHW layout, lane = spatial)
        # reg_ref: (1, Kr, ts)  regression tile     (NCHW layout, lane = spatial)
        x = x_ref[0]                                   # (C, ts)
        if compute_dtype is not None:
            # In-kernel cast only: HBM read stays at the caller's dtype.
            x = x.astype(compute_dtype)
        acc = jnp.dot(wt_ref[...], x,
                      preferred_element_type=jnp.float32)      # (Kf, ts) f32
        acc = acc + b_ref[...]                                   # f32 bias add
        cls_ref[0] = acc[:kc].astype(cls_ref.dtype)
        reg_ref[0] = acc[kc:].astype(reg_ref.dtype)
    return kernel


def prediction_head_pallas(x_nchw, wc, bc, wr, br, *,
                           spatial_tile=2048,
                           compute_dtype=None,
                           out_dtype=None,
                           vmem_budget_bytes=12 * 1024 * 1024):
    """SSD PredictionHead forward (two 1x1 convs) as one fused Pallas matmul.

    x_nchw: (N, C, H, W)
    wc:     (Kc, C)  classification weight (PyTorch Conv2d (out,in,1,1) squeezed)
    bc:     (Kc,)
    wr:     (Kr, C)  regression weight
    br:     (Kr,)
    Returns (class_logits (N, Kc, H, W), box_regression (N, Kr, H, W)).
    """
    N, C, H, W = x_nchw.shape
    Kc = wc.shape[0]
    Kr = wr.shape[0]
    Kf = Kc + Kr
    HW = H * W
    if out_dtype is None:
        out_dtype = x_nchw.dtype

    # --- fuse the two heads: one (Kf, C) weight (already W^T), one (Kf,1) bias
    wt = jnp.concatenate([wc, wr], axis=0)
    if compute_dtype is not None:
        wt = wt.astype(compute_dtype)          # tiny & resident: free in wrapper
    b = jnp.concatenate([bc, br], axis=0).reshape(Kf, 1).astype(jnp.float32)

    # --- channels-first straight through: NCHW -> (N, C, H*W). Free reshape,
    #     no padding, no wrapper cast of the activations.
    x3d = x_nchw.reshape(N, C, HW)

    x_item = x3d.dtype.itemsize
    o_item = jnp.dtype(out_dtype).itemsize
    w_item = wt.dtype.itemsize

    # --- spatial tile selection (lane-dense, VMEM-aware) ---------------------
    # Double-buffered per-step VMEM: x tile + cls tile + reg tile (+ weights).
    resident = 2 * (Kf * C * w_item + _round_up(Kf, 8) * 128 * 4)   # W + padded bias
    per_col = 2 * (C * x_item + Kf * o_item)
    avail = vmem_budget_bytes - resident
    vmem_cap = max(128, (max(avail, 0) // per_col) // 128 * 128)
    user_cap = max(128, (spatial_tile // 128) * 128)
    ts_cap = min(user_cap, vmem_cap)

    if HW <= ts_cap:
        ts = HW              # single full-extent tile: zero padding bytes moved
    else:
        ts = ts_cap          # multiple of 128; final grid tile may be ragged
    n_spatial = pl.cdiv(HW, ts)

    # v7x has 2 TensorCores: ensure >= 2 "parallel" grid steps when there is
    # enough spatial extent, so both cores contribute HBM bandwidth.
    if N * n_spatial == 1 and HW >= 256:
        ts = _round_up(pl.cdiv(HW, 2), 128)
        n_spatial = pl.cdiv(HW, ts)

    grid = (N, n_spatial)

    cost = pl.CostEstimate(
        flops=2 * N * HW * C * Kf,
        transcendentals=0,
        bytes_accessed=int(x3d.size * x_item
                           + wt.size * w_item
                           + b.size * 4
                           + N * Kf * HW * o_item),
    )

    kernel = _make_fused_head_kernel(Kc, compute_dtype)

    cls3, reg3 = pl.pallas_call(
        kernel,
        out_shape=(jax.ShapeDtypeStruct((N, Kc, HW), out_dtype),
                   jax.ShapeDtypeStruct((N, Kr, HW), out_dtype)),
        grid_spec=pltpu.PrefetchScalarGridSpec(
            num_scalar_prefetch=0,
            grid=grid,
            in_specs=[
                pl.BlockSpec((1, C, ts), lambda n, s: (n, 0, s)),   # x tile
                pl.BlockSpec((Kf, C), lambda n, s: (0, 0)),         # fused W^T
                pl.BlockSpec((Kf, 1), lambda n, s: (0, 0)),         # fused bias
            ],
            out_specs=[
                pl.BlockSpec((1, Kc, ts), lambda n, s: (n, 0, s)),  # cls tile
                pl.BlockSpec((1, Kr, ts), lambda n, s: (n, 0, s)),  # reg tile
            ],
        ),
        compiler_params=pltpu.CompilerParams(
            dimension_semantics=("parallel", "parallel"),
        ),
        cost_estimate=cost,
    )(x3d, wt, b)

    # Both outputs are already in NCHW order; only free reshapes remain.
    return cls3.reshape(N, Kc, H, W), reg3.reshape(N, Kr, H, W)


def _reference(x_nchw, wc, bc, wr, br):
    # Pure-JAX reference of the two 1x1 convs (NCHW in, NCHW out).
    cls = jnp.einsum('nchw,kc->nkhw', x_nchw, wc) + bc[None, :, None, None]
    reg = jnp.einsum('nchw,kc->nkhw', x_nchw, wr) + br[None, :, None, None]
    return cls, reg


if __name__ == "__main__":
    # Module hyperparameters (small, consistent with SSD prediction heads)
    N, C, H, W = 2, 32, 8, 8
    num_classes, num_anchors = 4, 6
    Kc = num_classes * num_anchors   # 24
    Kr = num_anchors * 4             # 24

    key = jax.random.PRNGKey(0)
    kx, kwc, kbc, kwr, kbr = jax.random.split(key, 5)

    x = jax.random.normal(kx, (N, C, H, W), dtype=jnp.float32)
    # Conv2d weights are (out, in, 1, 1) in PyTorch; stored squeezed as (out, in).
    wc = jax.random.normal(kwc, (Kc, C), dtype=jnp.float32) * 0.05
    bc = jax.random.normal(kbc, (Kc,), dtype=jnp.float32) * 0.05
    wr = jax.random.normal(kwr, (Kr, C), dtype=jnp.float32) * 0.05
    br = jax.random.normal(kbr, (Kr,), dtype=jnp.float32) * 0.05

    # --- basic path: single full-extent spatial tile (HW = 64) --------------
    cls_out, reg_out = prediction_head_pallas(x, wc, bc, wr, br)
    jax.block_until_ready((cls_out, reg_out))

    cls_ref, reg_ref = _reference(x, wc, bc, wr, br)
    assert cls_out.shape == (N, Kc, H, W)
    assert reg_out.shape == (N, Kr, H, W)
    assert jnp.allclose(cls_out, cls_ref, atol=1e-5, rtol=1e-5)
    assert jnp.allclose(reg_out, reg_ref, atol=1e-5, rtol=1e-5)

    # --- ragged multi-tile path: HW = 361 (19x19), N = 1 triggers the
    #     two-parallel-step split and a masked final tile. -------------------
    x2 = jax.random.normal(kbr, (1, C, 19, 19), dtype=jnp.float32)
    cls2, reg2 = prediction_head_pallas(x2, wc, bc, wr, br)
    jax.block_until_ready((cls2, reg2))
    cls2_ref, reg2_ref = _reference(x2, wc, bc, wr, br)
    assert jnp.allclose(cls2, cls2_ref, atol=1e-5, rtol=1e-5)
    assert jnp.allclose(reg2, reg2_ref, atol=1e-5, rtol=1e-5)

    # --- bf16 MXU path: x stays f32 in HBM (cast in-kernel), f32 accumulation
    #     and f32 bias add are preserved. ------------------------------------
    cls_bf, reg_bf = prediction_head_pallas(x, wc, bc, wr, br,
                                            compute_dtype=jnp.bfloat16)
    jax.block_until_ready((cls_bf, reg_bf))
    assert jnp.allclose(cls_bf, cls_ref, atol=5e-2, rtol=5e-2)
    assert jnp.allclose(reg_bf, reg_ref, atol=5e-2, rtol=5e-2)

    print("KERNEL_OK")
</pallas_src>

<mosaic_0001>
module attributes {stable_mosaic.version = 11 : i64} {
  func.func @kernel(%arg0: i32, %arg1: i32, %arg2: memref<1x32x64xf32, #tpu.memory_space<vmem>>, %arg3: memref<48x32xf32, #tpu.memory_space<vmem>>, %arg4: memref<48x1xf32, #tpu.memory_space<vmem>>, %arg5: memref<1x24x64xf32, #tpu.memory_space<vmem>>, %arg6: memref<1x24x64xf32, #tpu.memory_space<vmem>>) attributes {dimension_semantics = [#tpu.dimension_semantics<parallel>, #tpu.dimension_semantics<parallel>], iteration_bounds = array<i64: 2, 1>, scalar_prefetch = 0 : i64, scratch_operands = 0 : i64, tpu.core_type = #tpu.core_type<tc>, window_params = [{transform_indices = @transform_0, window_bounds = array<i64: 1, 32, 64>}, {pipeline_mode = #tpu.pipeline_mode<synchronous>, transform_indices = @transform_1, window_bounds = array<i64: 48, 32>}, {pipeline_mode = #tpu.pipeline_mode<synchronous>, transform_indices = @transform_2, window_bounds = array<i64: 48, 1>}, {transform_indices = @transform_3, window_bounds = array<i64: 1, 24, 64>}, {transform_indices = @transform_4, window_bounds = array<i64: 1, 24, 64>}]} {
    %c0 = arith.constant 0 : index
    %c0_0 = arith.constant 0 : index
    %c0_1 = arith.constant 0 : index
    %0 = vector.load %arg2[%c0, %c0_0, %c0_1] : memref<1x32x64xf32, #tpu.memory_space<vmem>>, vector<1x32x64xf32>
    %1 = vector.shape_cast %0 : vector<1x32x64xf32> to vector<32x64xf32>
    %c0_2 = arith.constant 0 : index
    %c0_3 = arith.constant 0 : index
    %2 = vector.load %arg3[%c0_2, %c0_3] : memref<48x32xf32, #tpu.memory_space<vmem>>, vector<48x32xf32>
    %cst = arith.constant dense<0.000000e+00> : vector<48x64xf32>
    %3 = tpu.matmul %2, %1, %cst {dimension_numbers = #tpu.dot_dimension_numbers<[1], [0], [0], [1], [0, 0, 1, 1], [], []>} : vector<48x32xf32>, vector<32x64xf32>, vector<48x64xf32> -> vector<48x64xf32>
    %c0_4 = arith.constant 0 : index
    %c0_5 = arith.constant 0 : index
    %4 = vector.load %arg4[%c0_4, %c0_5] : memref<48x1xf32, #tpu.memory_space<vmem>>, vector<48x1xf32>
    %5 = vector.broadcast %4 : vector<48x1xf32> to vector<48x64xf32>
    %6 = arith.addf %3, %5 : vector<48x64xf32>
    %7 = vector.extract_strided_slice %6 {offsets = [0, 0], sizes = [24, 64], strides = [1, 1]} : vector<48x64xf32> to vector<24x64xf32>
    %c0_6 = arith.constant 0 : index
    %c0_7 = arith.constant 0 : index
    %c0_8 = arith.constant 0 : index
    %8 = vector.load %arg5[%c0_6, %c0_7, %c0_8] : memref<1x24x64xf32, #tpu.memory_space<vmem>>, vector<1x24x64xf32>
    %9 = vector.shape_cast %8 : vector<1x24x64xf32> to vector<24x64xf32>
    %10 = vector.shape_cast %7 : vector<24x64xf32> to vector<1x24x64xf32>
    tpu.vector_store %arg5[%c0_6, %c0_7, %c0_8], %10 {strides = array<i32>} : memref<1x24x64xf32, #tpu.memory_space<vmem>>, vector<1x24x64xf32>,
    %11 = vector.extract_strided_slice %6 {offsets = [24, 0], sizes = [24, 64], strides = [1, 1]} : vector<48x64xf32> to vector<24x64xf32>
    %c0_9 = arith.constant 0 : index
    %c0_10 = arith.constant 0 : index
    %c0_11 = arith.constant 0 : index
    %12 = vector.load %arg6[%c0_9, %c0_10, %c0_11] : memref<1x24x64xf32, #tpu.memory_space<vmem>>, vector<1x24x64xf32>
    %13 = vector.shape_cast %12 : vector<1x24x64xf32> to vector<24x64xf32>
    %14 = vector.shape_cast %11 : vector<24x64xf32> to vector<1x24x64xf32>
    tpu.vector_store %arg6[%c0_9, %c0_10, %c0_11], %14 {strides = array<i32>} : memref<1x24x64xf32, #tpu.memory_space<vmem>>, vector<1x24x64xf32>,
    return
  }
  func.func @transform_0(%arg0: i32, %arg1: i32) -> (i32, i32, i32) {
    %c0_i32 = arith.constant 0 : i32
    %c0_i32_0 = arith.constant 0 : i32
    return %arg0, %c0_i32, %arg1 : i32, i32, i32
  }
  func.func @transform_1(%arg0: i32, %arg1: i32) -> (i32, i32) {
    %c0_i32 = arith.constant 0 : i32
    %c0_i32_0 = arith.constant 0 : i32
    %c0_i32_1 = arith.constant 0 : i32
    return %c0_i32, %c0_i32_0 : i32, i32
  }
  func.func @transform_2(%arg0: i32, %arg1: i32) -> (i32, i32) {
    %c0_i32 = arith.constant 0 : i32
    %c0_i32_0 = arith.constant 0 : i32
    %c0_i32_1 = arith.constant 0 : i32
    return %c0_i32, %c0_i32_0 : i32, i32
  }
  func.func @transform_3(%arg0: i32, %arg1: i32) -> (i32, i32, i32) {
    %c0_i32 = arith.constant 0 : i32
    %c0_i32_0 = arith.constant 0 : i32
    return %arg0, %c0_i32, %arg1 : i32, i32, i32
  }
  func.func @transform_4(%arg0: i32, %arg1: i32) -> (i32, i32, i32) {
    %c0_i32 = arith.constant 0 : i32
    %c0_i32_0 = arith.constant 0 : i32
    return %arg0, %c0_i32, %arg1 : i32, i32, i32
  }
}

</mosaic_0001>

<bundles_post_ra>
// kernel: tpu_custom_call.1
= control target key start
LH: loop header
LB: loop body
LE: loop exit
PB: predicated region body
PF: predicated region fallthrough
CT: control target
= control target key end

     0   :  { %10 = vsyncpa [#allocation3], 0  ;;  %s902_s0 = inlined_call_operand.vmem [shape: f32[2,32,64], index: 0, kind: input, shape index: {}]   ;;  %s903_s1 = inlined_call_operand.vmem [shape: f32[48,32], index: 1, kind: input, shape index: {}]   ;;  %s904_s2 = inlined_call_operand.vmem [shape: f32[48,1], index: 2, kind: input, shape index: {}]   ;;  %s905_s3 = inlined_call_operand.hbm [shape: f32[2,24,64], index: 3, kind: output, shape index: {0}]   ;;  %s906_s4 = inlined_call_operand.hbm [shape: f32[2,24,64], index: 4, kind: output, shape index: {1}]  }
   0x1   :  { %12 = vsyncpa [#allocation3 + $0x1], 0 }
   0x2   :  { %13 = vsyncpa [#allocation5], 0 }
   0x3   :  { %15 = vsyncpa [#allocation5 + $0x1], 0  ;;  %s733_s15 = smov 0   ;;  %s735_s16 = smov 0  }
   0x4   :  { %s737_s17 = smov 0   ;;  %s739_s18 = smov 0  }
   0x5   :  { %s741_s19 = smov 0   ;;  %s743_s20 = smov 0  }
   0x6 LB: > { %s494_s21 = sadd.s32 4294967295, %s703_s20   ;;  %s495_s22 = sadd.s32 4294967294, %s703_s20   ;;  %s703_s20 = sphi %s743_s20, %s21_s20   ;;  %s699_s19 = sphi %s741_s19, %s913_s19   ;;  %s695_s18 = sphi %s739_s18, %s912_s18   ;;  %s691_s17 = sphi %s737_s17, %s911_s17   ;;  %s687_s16 = sphi %s735_s16, %s910_s16   ;;  %s683_s15 = sphi %s733_s15, %s909_s15  }
   0x7   : > { %s33_s23 = sadd.s32 1, %s699_s19  ;;  %s112_s24 = sadd.s32 1, %s691_s17 }
   0x8   : > { %p35_p0 = scmp.ge.s32.totalorder %s33_s23, 2  ;;  %p122_p1 = scmp.ne.s32.totalorder %s691_s17, %s687_s16 }
   0x9   : > { %p123_p2 = scmp.eq.s32.totalorder %s494_s21, 1  ;;  %p128_p3 = scmp.ne.s32.totalorder %s687_s16, %s683_s15 }
   0xa   : > { %s915_s23 = smov (%p35_p0, %s33_s23), 0  ;;  %p129_p5 = scmp.eq.s32.totalorder %s495_s22, 1 }
   0xb   : > { %p773_p4 = por %p123_p2, %p122_p1  ;;  %s107_s26 = ssub.s32 %s699_s19, %s915_s23 }
   0xc   : > { %p498_p6 = scmp.ge.s32.totalorder %s703_s20, 1  ;;  %p110_p7 = scmp.eq.s32.totalorder %s107_s26, 0 }
   0xd   : > { %p780_p8 = por %p129_p5, %p128_p3  ;;  %p192_p9 = scmp.lt.s32.totalorder %s703_s20, 3 }
   0xe   : > { %s786_s28 = scalar_select %p110_p7, %s691_s17, %s112_s24  }
   0xf   : > { %p193_p10 = pnand %p498_p6, %p192_p9 }
  0x10   : > { %p226_p11 = scmp.lt.s32.totalorder (!%p193_p10), %s695_s18, 1  ;;  %s836_s22 = sand.u32 (!%p193_p10), 1, %s687_s16  }
  0x11   : > { %196 = sbr.rel (%p193_p10) target bundleno = 187 (0xbb), region = 32  ;;  %s342_s14 = scalar_lea.sflag (!%p193_p10), [#allocation3], %s836_s22 }
  0x12   : > { %s524_s24 = smul.u32 (!%p193_p10), 24, %s836_s22 }
  0x13   : > { %s525_s26 = smul.u32 (!%p193_p10), 24, %s695_s18 }
  0x14   : > { %s225_s11 = scalar_lea.vmem (!%p193_p10), [#allocation4], %s524_s24 }
  0x15   : > { %s359_s6 = scalar_lea.hbm (!%p193_p10), %s905_s3, %s525_s26  ;;  %s378_s12 = sshll.u32 (!%p193_p10), %s225_s11, 4  ;;  %s379_s12 = int_to_ptr.vmem [resolvable:$true] %s378_s12 }
  0x16   : > { %v705_v0 = vmov 0   ;;  %s227_s29 = scalar_select %p226_p11, %s695_s18, 1  ;;  %v246_v1 = vld [vmem:[%s904_s2 + $0x10] sm:$0xff]  ;;  %v244_v2 = vld [vmem:[%s904_s2] sm:$0xff]  ;;  %v239_v8 = vld [vmem:[%s903_s1 + $0x8] sm:$0xff]  ;;  %vm280_vm0 = vcmask 261120  }
  0x17   : > { %591 = vset.pattern.permute.xlu1 %v705_v0  ;;  %590 = vset.pattern.permute.xlu0 %v705_v0  ;;  %v248_v3 = vld [vmem:[%s904_s2 + $0x20] sm:$0xff]  ;;  %v241_v9 = vld [vmem:[%s903_s1 + $0x18] sm:$0xff]  ;;  %v245_v13 = vld [vmem:[%s904_s2 + $0x8] sm:$0xff]  ;;  %vm334_vm1 = vcmask 523264   ;;  %s362_s8 = sshll.u32 %s359_s6, 4  ;;  %s363_s8 = int_to_ptr.hbm [resolvable:$true] %s362_s8 }
  0x18   : > { %592 = vset.pattern.permute.xlu2 %v705_v0  ;;  %262 = vperm.xlu1 %591, %v246_v1   ;;  %s511_s10 = sshll.u32 %s227_s29, 5  ;;  %v242_v10 = vld [vmem:[%s903_s1 + $0x20] sm:$0xff]  ;;  %v247_v11 = vld [vmem:[%s904_s2 + $0x18] sm:$0xff]  ;;  %v249_v14 = vld [vmem:[%s904_s2 + $0x28] sm:$0xff]  ;;  %s218_s29 = scalar_lea.vmem [#allocation2], %s524_s24 }
  0x19   : > { %252 = vperm.xlu0 %590, %v244_v2   ;;  %272 = vperm.xlu2 %592, %v248_v3   ;;  %s233_s13 = scalar_lea.vmem %s902_s0, %s511_s10  ;;  %v238_v12 = vld [vmem:[%s903_s1] sm:$0xff]  ;;  %v240_v15 = vld [vmem:[%s903_s1 + $0x10] sm:$0xff]  ;;  %v243_v16 = vld [vmem:[%s903_s1 + $0x28] sm:$0xff]  ;;  %s360_s7 = sshll.u32 %s218_s29, 4  ;;  %s845_s7 = int_to_ptr.vmem [resolvable:$true] %s360_s7 }
  0x1a   : > { %v237_v4 = vld [vmem:[%s233_s13 + $0x18] sm:$0xff]  ;;  %v236_v5 = vld [vmem:[%s233_s13 + $0x10] sm:$0xff]  ;;  %v235_v6 = vld [vmem:[%s233_s13 + $0x8] sm:$0xff]  ;;  %s850_s10 = scalar_lea.hbm %s906_s4, %s525_s26  ;;  %s607_s21 = sshra.s32 %s363_s8, 4  ;;  %s608_s21 = int_to_ptr.hbm [resolvable:$true] %s607_s21 }
  0x1b   : > { %512 = vmatpush.msra.mxu1 %v237_v4  ;;  %513 = vmatpush.msra.mxu2 %v237_v4  ;;  %v234_v7 = vld [vmem:[%s233_s13] sm:$0xff]  ;;  %s380_s13 = sshll.u32 %s850_s10, 4  ;;  %s609_s30 = scalar_lea.hbm %s608_s21, 24  ;;  %s381_s13 = int_to_ptr.hbm [resolvable:$true] %s380_s13 }
  0x1c   : > { %514 = vmatpush.msra.mxu3 %v237_v4  ;;  %311 = vmatpush.msra.mxu0 %v237_v4  ;;  %p610_p12 = scmp.ne.s32.totalorder %s608_s21, %s609_s30  ;;  %s613_s24 = scalar_lea.hbm %s905_s3, 48 }
  0x1d   : > { %515 = vmatpush.msra.mxu1 %v236_v5  ;;  %516 = vmatpush.msra.mxu2 %v236_v5  ;;  %p614_p1 = scmp.lt.s32.totalorder %s608_s21, %s905_s3  ;;  %p615_p2 = scmp.lt.s32.totalorder %s613_s24, %s609_s30 }
  0x1e   : > { %517 = vmatpush.msra.mxu3 %v236_v5  ;;  %312 = vmatpush.msra.mxu0 %v236_v5  ;;  %p611_p13 = pnand %p610_p12, %p773_p4 }
  0x1f   : > { %518 = vmatpush.msra.mxu1 %v235_v6  ;;  %519 = vmatpush.msra.mxu2 %v235_v6  ;;  %p616_p3 = por %p615_p2, %p614_p1 }
  0x20   : > { %520 = vmatpush.msra.mxu3 %v235_v6  ;;  %313 = vmatpush.msra.mxu0 %v235_v6  ;;  %p612_p0 = pneg %p611_p13 }
  0x21   : > { %521 = vmatpush.msra.mxu1 %v234_v7  ;;  %522 = vmatpush.msra.mxu2 %v234_v7 }
  0x22   : > { %523 = vmatpush.msra.mxu3 %v234_v7  ;;  %502 = vmatmul.msk.f32.vlgmr.msra.gmra.mxu1 %vm280_vm0, %v239_v8  ;;  %p617_p5 = pnand %p616_p3, %p612_p0 }
  0x23   : > { %504 = vmatmul.msk.f32.vlgmr.msra.gmra.mxu2 %vm280_vm0, %v241_v9  ;;  %505 = vmatmul.msk.f32.vlgmr.msra.gmra.mxu3 %vm280_vm0, %v242_v10 }
  0x24   : > { %314 = vmatpush.msra.mxu0 %v234_v7  ;;  %267 = vperm.xlu1 %591, %v247_v11  }
  0x25   : > { %501 = vmatmul.msk.f32.vlgmr.msra.gmra.mxu0 %vm280_vm0, %v238_v12  ;;  %257 = vperm.xlu0 %590, %v245_v13  }
  0x26   : > { %277 = vperm.xlu2 %592, %v249_v14  }
  0x2a   : > { %503 = vmatmul.msk.f32.gmra.mxu1 %vm280_vm0, %v240_v15 }
  0x2b   : > { %506 = vmatmul.msk.f32.gmra.mxu3 %vm280_vm0, %v243_v16 }
  0x73   : > { %v273_v24 = vpop.permute.xlu2 %272 }
  0x8a   : > { %v263_v18 = vpop.permute.xlu1 %262 }
  0x8b   : > { %v253_v17 = vpop.permute.xlu0 %252 }
  0x96   : > { %v268_v25 = vpop.permute.xlu1 %267 }
  0x97   : > { %v258_v19 = vpop.permute.xlu0 %257 }
  0x9f   : > { %v319_v20 = vpop.f32.mrf.mxu1 }
  0xa0   : > { %v320_v21 = vadd.f32 %v319_v20, %v258_v19 }
  0xa2   : > { %336 = vst.msk [vmem:[%s218_s29 + $0x8] sm:$0xff] %vm334_vm1, %v320_v21  ;;  %v316_v22 = vpop.f32.mrf.mxu0 }
  0xa3   : > { %v317_v23 = vadd.f32 %v316_v22, %v253_v17 }
  0xa5   : > { %335 = vst.msk [vmem:[%s218_s29] sm:$0xff] %vm334_vm1, %v317_v23 }
  0xa6   : > { %v325_v26 = vpop.f32.mrf.mxu2  ;;  %v328_v27 = vpop.f32.mrf.mxu3 }
  0xa7   : > { %v326_v28 = vadd.f32 %v325_v26, %v268_v25  ;;  %v329_v29 = vadd.f32 %v328_v27, %v273_v24  ;;  %v322_v30 = vpop.f32.mrf.mxu1 }
  0xa8   : > { %v323_v31 = vadd.f32 %v322_v30, %v263_v18 }
  0xa9   : > { %338 = vst.msk [vmem:[%s225_s11] sm:$0xff] %vm334_vm1, %v326_v28 }
  0xaa   : > { %339 = vst.msk [vmem:[%s225_s11 + $0x8] sm:$0xff] %vm334_vm1, %v329_v29 }
  0xab   : > { %337 = vst.msk [vmem:[%s218_s29 + $0x10] sm:$0xff] %vm334_vm1, %v323_v31 }
  0xac   : > { %620 = shalt.err (!%p617_p5)
}
  0xad   : > { %s706_s29 = smov 128   ;;  %s707_s9 = smov 8   ;;  %v278_v32 = vpop.permute.xlu2 %277 }
  0xae   : > { %527 = dma.vmem_to_hbm [thread:$0]  (%p773_p4), %s845_s7, 384, %s363_s8, %s342_s14, %s706_s29, %s706_s29, %s707_s9   ;;  %v331_v33 = vpop.f32.mrf.mxu3 }
  0xaf   : > { %v332_v34 = vadd.f32 %v331_v33, %v278_v32  ;;  %s347_s10 = scalar_lea.sflag [#allocation5], %s836_s22  ;;  %s635_s21 = sshra.s32 %s381_s13, 4  ;;  %s636_s21 = int_to_ptr.hbm [resolvable:$true] %s635_s21 }
  0xb0   : > { %s637_s30 = scalar_lea.hbm %s636_s21, 24  ;;  %s641_s24 = scalar_lea.hbm %s906_s4, 48 }
  0xb1   : > { %340 = vst.msk [vmem:[%s225_s11 + $0x10] sm:$0xff] %vm334_vm1, %v332_v34  ;;  %p638_p6 = scmp.ne.s32.totalorder %s636_s21, %s637_s30  ;;  %p642_p10 = scmp.lt.s32.totalorder %s636_s21, %s906_s4 }
  0xb2   : > { %p643_p11 = scmp.lt.s32.totalorder %s641_s24, %s637_s30 }
  0xb3   : > { %p639_p7 = pnand %p638_p6, %p773_p4 }
  0xb4   : > { %p644_p12 = por %p643_p11, %p642_p10 }
  0xb5   : > { %p640_p9 = pneg %p639_p7 }
  0xb7   : > { %p645_p13 = pnand %p644_p12, %p640_p9 }
  0xb9   : > { %648 = shalt.err (!%p645_p13)
}
  0xba   : > { %528 = dma.vmem_to_hbm [thread:$0]  (%p773_p4), %s379_s12, 384, %s381_s13, %s347_s10, %s706_s29, %s706_s29, %s707_s9  }
  0xbb PF: > { %p538_p0 = scmp.ge.s32.totalorder %s703_s20, 2  ;;  %s395_s22 = sand.u32 1, %s683_s15  }
  0xbc   : > { %s396_s11 = scalar_lea.sflag [#allocation3], %s395_s22 }
  0xbd   : > { %p532_p1 = pnand %p538_p0, %p780_p8 }
  0xbf   : > { %p533_p2 = pneg %p532_p1 }
  0xc1   : > { %674 = dma.done.wait (%p533_p2), %s396_s11, 384  }
  0xc2   : > { %676 = vsyncadd (%p533_p2), %s396_s11, 4294966912  ;;  %s406_s14 = scalar_lea.sflag [#allocation5], %s395_s22 }
  0xc3   : > { %678 = dma.done.wait (%p533_p2), %s406_s14, 384  }
  0xc4   : > { %680 = vsyncadd (%p533_p2), %s406_s14, 4294966912  ;;  %s21_s20 = sadd.s32 1, %s703_s20   ;;  %s909_s15 = smov %s687_s16 }
  0xc5   : > { %p18_p3 = scmp.ge.s32.totalorder %s21_s20, 4   ;;  %s910_s16 = smov %s691_s17 }
  0xc6   : > { %s911_s17 = smov %s786_s28  ;;  %s912_s18 = smov %s699_s19 }
  0xc7   : > { %s913_s19 = smov %s915_s23  ;;  %20 = sbr.rel (!%p18_p3) target bundleno = 6 (0x6), region = 84 }
  0xcc   :  { %412 = vsyncpa [#allocation3], 1 }
  0xcd   :  { %414 = vsyncpa [#allocation3 + $0x1], 1 }
  0xce   :  { %415 = vsyncpa [#allocation5], 1 }
  0xcf   :  { %417 = vsyncpa [#allocation5 + $0x1], 1 }

</bundles_post_ra>
